<compile_context>
chip_gen: v5e
topology: v5e:2x2
jax: 0.10.0
libtpu: 0.0.40
codegen_flags: <defaults>
</compile_context>

<pallas_src>
import functools

import jax
import jax.numpy as jnp
from jax.experimental import pallas as pl
from jax.experimental.pallas import tpu as pltpu

EPS = 1e-5


def _round_up(a, b):
    return (a + b - 1) // b * b


# ----------------------------------------------------------------------------
# Fused implicit-GEMM conv + per-channel partial BN stats.  One grid step = one
# image (ReLU already applied in the producing XLA fusion).
#   x_ref:    (1, C_in, L)          bf16  ReLU'd, spatially padded, flattened image
#   w_ref:    (C_out, KH*KW*C_in)   bf16  flattened conv weights
#   mask_ref: (1, Lslab)            f32   1.0 on valid output columns, else 0.0
#   y_ref:    (1, C_out, Lslab)     bf16  lane-dense conv-output slab (padded cols incl.)
#   stats_ref:(1, C_out, 2)         f32   per-image per-channel [sum, sum_sq]
# ----------------------------------------------------------------------------
def _relu_conv_stats_kernel(x_ref, w_ref, mask_ref, y_ref, stats_ref, *,
                            KH, KW, Wp, Lslab, stride):
    x = x_ref[0]                                          # (C_in, L) bf16

    # flat-offset trick: input flat idx = stride*p + (kh*Wp + kw), p = oh*Wp + ow
    taps = []
    for kh in range(KH):
        for kw in range(KW):
            off = kh * Wp + kw
            if stride == 1:
                taps.append(x[:, off:off + Lslab])        # contiguous lane slice
            else:
                # TODO(synk): stride>1 path (strided lane slice) is not exercised
                # by the test below.
                taps.append(jax.lax.slice(
                    x, (0, off), (x.shape[0], off + stride * (Lslab - 1) + 1),
                    (1, stride)))
    rhs = jnp.concatenate(taps, axis=0)                   # (KH*KW*C_in, Lslab) bf16

    # single MXU contraction, f32 accumulation
    acc = jnp.dot(w_ref[...], rhs,
                  preferred_element_type=jnp.float32)     # (C_out, Lslab) f32

    # lane-dense bf16 slab store (Lslab is a multiple of 128 -> unmasked stores)
    y_ref[0] = acc.astype(y_ref.dtype)

    # fused partial BatchNorm statistics over valid output columns (f32)
    masked = acc * mask_ref[...]                          # one full-width multiply
    s = jnp.sum(masked, axis=1, keepdims=True)            # (C_out, 1)
    ss = jnp.sum(masked * acc, axis=1, keepdims=True)     # (C_out, 1)
    stats_ref[0] = jnp.concatenate([s, ss], axis=1)       # single (C_out, 2) store


# ----------------------------------------------------------------------------
# Wrapper reproducing ReLUConvBN.forward (NCHW in, NCHW out)
# ----------------------------------------------------------------------------
@functools.partial(jax.jit, static_argnames=("stride", "padding"))
def relu_conv_bn(x, weight, gamma, beta, *, stride, padding):
    """x: (N, C_in, H, W).  weight: (C_out, C_in, KH, KW).  Returns NCHW f32."""
    N, C_in, H, W = x.shape
    C_out, _, KH, KW = weight.shape
    OH = (H + 2 * padding - KH) // stride + 1
    OW = (W + 2 * padding - KW) // stride + 1
    Hp, Wp = H + 2 * padding, W + 2 * padding

    Lslab = _round_up(OH * Wp, 128)                       # lane-dense slab width
    max_off = (KH - 1) * Wp + (KW - 1)
    L = _round_up(max_off + stride * (Lslab - 1) + 1, 128)
    L = max(L, _round_up(Hp * Wp, 128))

    # ReLU + spatial pad + flatten + bf16 cast fuse into one XLA copy.
    xr = jnp.maximum(x, 0.0)
    xp = jnp.pad(xr, ((0, 0), (0, 0), (padding, padding), (padding, padding)))
    xf = jnp.pad(xp.reshape(N, C_in, Hp * Wp),
                 ((0, 0), (0, 0), (0, L - Hp * Wp))).astype(jnp.bfloat16)

    # Weights as ONE (C_out, KH*KW*C_in) bf16 MXU operand; row order matches the
    # tap-major / channel-minor RHS concatenation inside the kernel.
    wf = weight.transpose(0, 2, 3, 1).reshape(C_out, KH * KW * C_in)
    wf = wf.astype(jnp.bfloat16)

    # Valid output columns in flat padded coordinates p = oh*Wp + ow.
    p = jnp.arange(Lslab, dtype=jnp.int32)
    mask = ((p < OH * Wp) & (p % Wp < OW)).astype(jnp.float32).reshape(1, Lslab)

    cp = pltpu.CompilerParams(dimension_semantics=("parallel",),
                              vmem_limit_bytes=32 * 1024 * 1024)

    y, stats = pl.pallas_call(
        functools.partial(_relu_conv_stats_kernel, KH=KH, KW=KW, Wp=Wp,
                          Lslab=Lslab, stride=stride),
        out_shape=(jax.ShapeDtypeStruct((N, C_out, Lslab), jnp.bfloat16),
                   jax.ShapeDtypeStruct((N, C_out, 2), jnp.float32)),
        grid_spec=pltpu.PrefetchScalarGridSpec(
            num_scalar_prefetch=0,
            grid=(N,),
            in_specs=[
                pl.BlockSpec((1, C_in, L), lambda n: (n, 0, 0)),
                pl.BlockSpec((C_out, KH * KW * C_in), lambda n: (0, 0)),
                pl.BlockSpec((1, Lslab), lambda n: (0, 0)),
            ],
            out_specs=[
                pl.BlockSpec((1, C_out, Lslab), lambda n: (n, 0, 0)),
                pl.BlockSpec((1, C_out, 2), lambda n: (n, 0, 0)),
            ]),
        compiler_params=cp,
    )(xf, wf, mask)

    # Finish the (tiny) global BN reduction in plain JAX: biased batch variance.
    m_total = N * OH * OW
    s_tot = jnp.sum(stats[:, :, 0], axis=0)               # (C_out,)
    ss_tot = jnp.sum(stats[:, :, 1], axis=0)               # (C_out,)
    mean = s_tot / m_total
    var = jnp.maximum(ss_tot / m_total - mean * mean, 0.0)
    inv = jax.lax.rsqrt(var + EPS)
    g = gamma.astype(jnp.float32)
    b = beta.astype(jnp.float32)
    scale = (g * inv).reshape(1, C_out, 1, 1)
    shift = (b - mean * g * inv).reshape(1, C_out, 1, 1)

    # Compaction (one strided slice) + affine BN apply, fused by XLA.
    y_valid = y[:, :, :OH * Wp].reshape(N, C_out, OH, Wp)[..., :OW]
    return y_valid.astype(jnp.float32) * scale + shift


# ----------------------------------------------------------------------------
# Reference mirroring the kernel's numerics (bf16 MXU inputs, f32 accumulation
# and BN math, bf16 intermediate activation slab).
# ----------------------------------------------------------------------------
def reference(x, weight, gamma, beta, stride, padding):
    r = jnp.maximum(x, 0.0).astype(jnp.bfloat16)
    w = weight.astype(jnp.bfloat16)
    conv = jax.lax.conv_general_dilated(
        r, w, (stride, stride),
        [(padding, padding), (padding, padding)],
        dimension_numbers=("NCHW", "OIHW", "NCHW"),
        preferred_element_type=jnp.float32)
    mean = conv.mean(axis=(0, 2, 3), keepdims=True)
    var = ((conv - mean) ** 2).mean(axis=(0, 2, 3), keepdims=True)
    inv = jax.lax.rsqrt(var + EPS)
    g = gamma.reshape(1, -1, 1, 1)
    b = beta.reshape(1, -1, 1, 1)
    conv_q = conv.astype(jnp.bfloat16).astype(jnp.float32)  # mirror bf16 slab store
    return conv_q * (g * inv) + (b - mean * g * inv)


if __name__ == "__main__":
    # ReLUConvBN(C_in=4, C_out=8, kernel_size=3, stride=1, padding=1, affine=True)
    C_in, C_out, kernel_size, stride, padding = 4, 8, 3, 1, 1
    N, H, W = 2, 16, 16

    key = jax.random.PRNGKey(0)
    kx, kw = jax.random.split(key)
    x = jax.random.normal(kx, (N, C_in, H, W), dtype=jnp.float32)
    weight = 0.1 * jax.random.normal(
        kw, (C_out, C_in, kernel_size, kernel_size), dtype=jnp.float32)
    gamma = jnp.ones((C_out,), dtype=jnp.float32)   # BatchNorm2d affine init
    beta = jnp.zeros((C_out,), dtype=jnp.float32)

    out = relu_conv_bn(x, weight, gamma, beta, stride=stride, padding=padding)
    out = jax.block_until_ready(out)

    ref = reference(x, weight, gamma, beta, stride, padding)
    assert out.shape == (N, C_out, H, W), out.shape
    err = float(jnp.max(jnp.abs(out - ref)))
    # outputs are ~unit variance after BN; allow a couple of bf16 ulps of the
    # intermediate slab amplified by 1/std.
    assert err < 5e-3, err

    print("KERNEL_OK")
</pallas_src>

<mosaic_0001>
module attributes {stable_mosaic.version = 11 : i64} {
  func.func @_relu_conv_stats_kernel(%arg0: i32, %arg1: memref<1x4x512xbf16, #tpu.memory_space<vmem>>, %arg2: memref<8x36xbf16, #tpu.memory_space<vmem>>, %arg3: memref<1x384xf32, #tpu.memory_space<vmem>>, %arg4: memref<1x8x384xbf16, #tpu.memory_space<vmem>>, %arg5: memref<1x8x2xf32, #tpu.memory_space<vmem>>) attributes {dimension_semantics = [#tpu.dimension_semantics<parallel>], iteration_bounds = array<i64: 2>, scalar_prefetch = 0 : i64, scratch_operands = 0 : i64, tpu.core_type = #tpu.core_type<tc>, window_params = [{transform_indices = @transform_0, window_bounds = array<i64: 1, 4, 512>}, {pipeline_mode = #tpu.pipeline_mode<synchronous>, transform_indices = @transform_1, window_bounds = array<i64: 8, 36>}, {pipeline_mode = #tpu.pipeline_mode<synchronous>, transform_indices = @transform_2, window_bounds = array<i64: 1, 384>}, {transform_indices = @transform_3, window_bounds = array<i64: 1, 8, 384>}, {transform_indices = @transform_4, window_bounds = array<i64: 1, 8, 2>}]} {
    %c0 = arith.constant 0 : index
    %c0_0 = arith.constant 0 : index
    %c0_1 = arith.constant 0 : index
    %0 = vector.load %arg1[%c0, %c0_0, %c0_1] : memref<1x4x512xbf16, #tpu.memory_space<vmem>>, vector<1x4x512xbf16>
    %1 = vector.shape_cast %0 : vector<1x4x512xbf16> to vector<4x512xbf16>
    %2 = vector.extract_strided_slice %1 {offsets = [0, 0], sizes = [4, 384], strides = [1, 1]} : vector<4x512xbf16> to vector<4x384xbf16>
    %3 = vector.extract_strided_slice %1 {offsets = [0, 1], sizes = [4, 384], strides = [1, 1]} : vector<4x512xbf16> to vector<4x384xbf16>
    %4 = vector.extract_strided_slice %1 {offsets = [0, 2], sizes = [4, 384], strides = [1, 1]} : vector<4x512xbf16> to vector<4x384xbf16>
    %5 = vector.extract_strided_slice %1 {offsets = [0, 18], sizes = [4, 384], strides = [1, 1]} : vector<4x512xbf16> to vector<4x384xbf16>
    %6 = vector.extract_strided_slice %1 {offsets = [0, 19], sizes = [4, 384], strides = [1, 1]} : vector<4x512xbf16> to vector<4x384xbf16>
    %7 = vector.extract_strided_slice %1 {offsets = [0, 20], sizes = [4, 384], strides = [1, 1]} : vector<4x512xbf16> to vector<4x384xbf16>
    %8 = vector.extract_strided_slice %1 {offsets = [0, 36], sizes = [4, 384], strides = [1, 1]} : vector<4x512xbf16> to vector<4x384xbf16>
    %9 = vector.extract_strided_slice %1 {offsets = [0, 37], sizes = [4, 384], strides = [1, 1]} : vector<4x512xbf16> to vector<4x384xbf16>
    %10 = vector.extract_strided_slice %1 {offsets = [0, 38], sizes = [4, 384], strides = [1, 1]} : vector<4x512xbf16> to vector<4x384xbf16>
    %11 = tpu.concatenate %2, %3, %4, %5, %6, %7, %8, %9, %10 in 0 : vector<4x384xbf16>, vector<4x384xbf16>, vector<4x384xbf16>, vector<4x384xbf16>, vector<4x384xbf16>, vector<4x384xbf16>, vector<4x384xbf16>, vector<4x384xbf16>, vector<4x384xbf16> -> vector<36x384xbf16>
    %c0_2 = arith.constant 0 : index
    %c0_3 = arith.constant 0 : index
    %12 = vector.load %arg2[%c0_2, %c0_3] : memref<8x36xbf16, #tpu.memory_space<vmem>>, vector<8x36xbf16>
    %cst = arith.constant dense<0.000000e+00> : vector<8x384xf32>
    %13 = tpu.matmul %12, %11, %cst {dimension_numbers = #tpu.dot_dimension_numbers<[1], [0], [0], [1], [0, 0, 1, 1], [], []>} : vector<8x36xbf16>, vector<36x384xbf16>, vector<8x384xf32> -> vector<8x384xf32>
    %14 = arith.truncf %13 : vector<8x384xf32> to vector<8x384xbf16>
    %c0_4 = arith.constant 0 : index
    %c0_5 = arith.constant 0 : index
    %c0_6 = arith.constant 0 : index
    %15 = vector.load %arg4[%c0_4, %c0_5, %c0_6] : memref<1x8x384xbf16, #tpu.memory_space<vmem>>, vector<1x8x384xbf16>
    %16 = vector.shape_cast %15 : vector<1x8x384xbf16> to vector<8x384xbf16>
    %17 = vector.shape_cast %14 : vector<8x384xbf16> to vector<1x8x384xbf16>
    tpu.vector_store %arg4[%c0_4, %c0_5, %c0_6], %17 {strides = array<i32>} : memref<1x8x384xbf16, #tpu.memory_space<vmem>>, vector<1x8x384xbf16>,
    %c0_7 = arith.constant 0 : index
    %c0_8 = arith.constant 0 : index
    %18 = vector.load %arg3[%c0_7, %c0_8] : memref<1x384xf32, #tpu.memory_space<vmem>>, vector<1x384xf32>
    %19 = vector.broadcast %18 : vector<1x384xf32> to vector<8x384xf32>
    %20 = arith.mulf %13, %19 : vector<8x384xf32>
    %cst_9 = arith.constant dense<0.000000e+00> : vector<8xf32>
    %21 = vector.multi_reduction <add>, %20, %cst_9 [1] : vector<8x384xf32> to vector<8xf32>
    %22 = vector.shape_cast %21 : vector<8xf32> to vector<8x1xf32>
    %23 = arith.mulf %20, %13 : vector<8x384xf32>
    %cst_10 = arith.constant dense<0.000000e+00> : vector<8xf32>
    %24 = vector.multi_reduction <add>, %23, %cst_10 [1] : vector<8x384xf32> to vector<8xf32>
    %25 = vector.shape_cast %24 : vector<8xf32> to vector<8x1xf32>
    %26 = tpu.concatenate %22, %25 in 1 : vector<8x1xf32>, vector<8x1xf32> -> vector<8x2xf32>
    %c0_11 = arith.constant 0 : index
    %c0_12 = arith.constant 0 : index
    %c0_13 = arith.constant 0 : index
    %27 = vector.load %arg5[%c0_11, %c0_12, %c0_13] : memref<1x8x2xf32, #tpu.memory_space<vmem>>, vector<1x8x2xf32>
    %28 = vector.shape_cast %27 : vector<1x8x2xf32> to vector<8x2xf32>
    %29 = vector.shape_cast %26 : vector<8x2xf32> to vector<1x8x2xf32>
    tpu.vector_store %arg5[%c0_11, %c0_12, %c0_13], %29 {strides = array<i32>} : memref<1x8x2xf32, #tpu.memory_space<vmem>>, vector<1x8x2xf32>,
    return
  }
  func.func @transform_0(%arg0: i32) -> (i32, i32, i32) {
    %c0_i32 = arith.constant 0 : i32
    %c0_i32_0 = arith.constant 0 : i32
    %c0_i32_1 = arith.constant 0 : i32
    return %arg0, %c0_i32, %c0_i32_0 : i32, i32, i32
  }
  func.func @transform_1(%arg0: i32) -> (i32, i32) {
    %c0_i32 = arith.constant 0 : i32
    %c0_i32_0 = arith.constant 0 : i32
    %c0_i32_1 = arith.constant 0 : i32
    return %c0_i32, %c0_i32_0 : i32, i32
  }
  func.func @transform_2(%arg0: i32) -> (i32, i32) {
    %c0_i32 = arith.constant 0 : i32
    %c0_i32_0 = arith.constant 0 : i32
    %c0_i32_1 = arith.constant 0 : i32
    return %c0_i32, %c0_i32_0 : i32, i32
  }
  func.func @transform_3(%arg0: i32) -> (i32, i32, i32) {
    %c0_i32 = arith.constant 0 : i32
    %c0_i32_0 = arith.constant 0 : i32
    %c0_i32_1 = arith.constant 0 : i32
    return %arg0, %c0_i32, %c0_i32_0 : i32, i32, i32
  }
  func.func @transform_4(%arg0: i32) -> (i32, i32, i32) {
    %c0_i32 = arith.constant 0 : i32
    %c0_i32_0 = arith.constant 0 : i32
    %c0_i32_1 = arith.constant 0 : i32
    return %arg0, %c0_i32, %c0_i32_0 : i32, i32, i32
  }
}

</mosaic_0001>

<bundles_post_ra>
// kernel: relu_conv_bn.1
= control target key start
LH: loop header
LB: loop body
LE: loop exit
PB: predicated region body
PF: predicated region fallthrough
CT: control target
= control target key end

     0   :  { %s680_s15 = smov 0   ;;  %s815_s0 = inlined_call_operand.vmem [shape: bf16[2,4,512], index: 0, kind: input, shape index: {}]   ;;  %s816_s1 = inlined_call_operand.vmem [shape: bf16[8,36], index: 1, kind: input, shape index: {}]   ;;  %s817_s2 = inlined_call_operand.vmem [shape: f32[1,384], index: 2, kind: input, shape index: {}]   ;;  %s818_s3 = inlined_call_operand.vmem [shape: bf16[2,8,384], index: 3, kind: output, shape index: {0}]   ;;  %s819_s4 = inlined_call_operand.vmem [shape: f32[2,8,2], index: 4, kind: output, shape index: {1}]  }
   0x1 LB: > { %s607_s16 = sadd.s32 4294967295, %s645_s15   ;;  %p611_p0 = scmp.ge.s32.totalorder %s645_s15, 1  ;;  %s645_s15 = sphi %s680_s15, %s15_s15  }
   0x2   : > { %p165_p1 = scmp.lt.s32.totalorder %s645_s15, 3 }
   0x4   : > { %p166_p2 = pnand %p611_p0, %p165_p1 }
   0x5   : > { %p195_p3 = scmp.lt.s32.totalorder (!%p166_p2), %s607_s16, 1  ;;  %s647_s21 = smov (!%p166_p2), 127  }
   0x6   : > { %169 = sbr.rel (%p166_p2) target bundleno = 505 (0x1f9), region = 32  ;;  %s648_s22 = smov (!%p166_p2), 126  }
   0x7   : > { %s649_s23 = smov (!%p166_p2), 110   ;;  %s650_s24 = smov (!%p166_p2), 109  }
   0x8   : > { %s651_s25 = smov (!%p166_p2), 108   ;;  %s652_s26 = smov (!%p166_p2), 92  }
   0x9   : > { %s653_s27 = smov (!%p166_p2), 91   ;;  %s654_s28 = smov (!%p166_p2), 90  }
   0xb   : > { %s821_s16 = smov (!%p195_p3, %s607_s16), 1  ;;  %vm234_vm0 = vcmask 1039360   ;;  %vm390_vm1 = vcmask 1041408   ;;  %vm256_vm2 = vcmask 1031168   ;;  %vm397_vm3 = vcmask 1043456  }
   0xc   : > { %s621_s17 = sshll.u32 %s821_s16, 3  ;;  %vm278_vm4 = vcmask 900096   ;;  %vm404_vm5 = vcmask 1045504   ;;  %vm386_vm6 = vcmask 736256   ;;  %vm321_vm7 = vcmask 883712   ;;  %s622_s7 = smul.u32 12, %s821_s16 }
   0xd   : > { %s199_s20 = scalar_lea.vmem %s815_s0, %s621_s17  ;;  %vm343_vm8 = vcmask 752640   ;;  %vm299_vm9 = vcmask 891904   ;;  %vm365_vm10 = vcmask 744448   ;;  %vm439_vm11 = vcmask 293888   ;;  %s208_s13 = scalar_lea.vmem %s819_s4, %s621_s17 }
   0xe   : > { %v696_v0 = vld [vmem:[%s199_s20] sm:$0xff]  ;;  %s204_s10 = scalar_lea.vmem %s818_s3, %s622_s7  ;;  %vm517_vm12 = vcmask 7168   ;;  %vm519_vm13 = vcmask 15360  }
   0xf   : > { %212 = vst [vmem:[#allocation1] ss:$4 sm:$0xff] %v696_v0 }
  0x16   : > { %v699_v1 = vld.sshfl [vmem:[#allocation1] sm:$0xff pattern:$0x73625140]  ;;  %v701_v2 = vld.sshfl [vmem:[#allocation1 + $0x8] sm:$0xff pattern:$0x73625140] }
  0x17   : > { %v703_v3 = vld.sshfl [vmem:[#allocation1 + $0x10] sm:$0xff pattern:$0x73625140] }
  0x18   : > { %217 = vst [vmem:[#allocation1 + $0x1] ss:$4 sm:$0xff] %v696_v0 }
  0x1f   : > { %v224_v4 = vld.sshfl [vmem:[#allocation1 + $0x18] sm:$0xff pattern:$0x73625140]  ;;  %v218_v5 = vld.sshfl [vmem:[#allocation1] sm:$0xff pattern:$0x73625140] }
  0x20   : > { %232 = vrot.lane.b32.xlu1 %v224_v4, %s647_s21  ;;  %v707_v6 = vld.sshfl [vmem:[#allocation1 + $0x8] sm:$0xff pattern:$0x73625140]  ;;  %v222_v7 = vld.sshfl [vmem:[#allocation1 + $0x10] sm:$0xff pattern:$0x73625140]  ;;  %226 = vrot.lane.b32.xlu2 %v218_v5, %s647_s21 }
  0x21   : > { %239 = vst [vmem:[#allocation1 + $0x2] ss:$4 sm:$0xff] %v696_v0  ;;  %230 = vrot.lane.b32.xlu0 %v222_v7, %s647_s21 }
  0x28   : > { %v240_v8 = vld.sshfl [vmem:[#allocation1] sm:$0xff pattern:$0x73625140]  ;;  %v712_v9 = vld.sshfl [vmem:[#allocation1 + $0x8] sm:$0xff pattern:$0x73625140] }
  0x29   : > { %v244_v10 = vld.sshfl [vmem:[#allocation1 + $0x10] sm:$0xff pattern:$0x73625140]  ;;  %v246_v11 = vld.sshfl [vmem:[#allocation1 + $0x18] sm:$0xff pattern:$0x73625140] }
  0x2a   : > { %254 = vrot.lane.b32.xlu1 %v246_v11, %s648_s22  ;;  %261 = vst [vmem:[#allocation1 + $0x3] ss:$4 sm:$0xff] %v696_v0  ;;  %252 = vrot.lane.b32.xlu0 %v244_v10, %s648_s22 }
  0x31   : > { %v268_v12 = vld.sshfl [vmem:[#allocation1 + $0x18] sm:$0xff pattern:$0x73625140]  ;;  %v262_v13 = vld.sshfl [vmem:[#allocation1] sm:$0xff pattern:$0x73625140] }
  0x32   : > { %276 = vrot.lane.b32.xlu2 %v268_v12, %s649_s23  ;;  %v264_v14 = vld.sshfl [vmem:[#allocation1 + $0x8] sm:$0xff pattern:$0x73625140]  ;;  %v266_v15 = vld.sshfl [vmem:[#allocation1 + $0x10] sm:$0xff pattern:$0x73625140] }
  0x33   : > { %274 = vrot.lane.b32.xlu1 %v266_v15, %s649_s23  ;;  %282 = vst [vmem:[#allocation1] ss:$4 sm:$0xff] %v696_v0 }
  0x3a   : > { %v287_v16 = vld.sshfl [vmem:[#allocation1 + $0x10] sm:$0xff pattern:$0x73625140]  ;;  %v283_v17 = vld.sshfl [vmem:[#allocation1] sm:$0xff pattern:$0x73625140] }
  0x3b   : > { %295 = vrot.lane.b32.xlu1 %v287_v16, %s650_s24  ;;  %291 = vrot.lane.b32.xlu2 %v283_v17, %s650_s24  ;;  %v289_v18 = vld.sshfl [vmem:[#allocation1 + $0x18] sm:$0xff pattern:$0x73625140]  ;;  %v285_v19 = vld.sshfl [vmem:[#allocation1 + $0x8] sm:$0xff pattern:$0x73625140] }
  0x3c   : > { %293 = vrot.lane.b32.xlu0 %v285_v19, %s650_s24  ;;  %304 = vst [vmem:[#allocation1 + $0x1] ss:$4 sm:$0xff] %v696_v0 }
  0x43   : > { %297 = vrot.lane.b32.xlu1 %v289_v18, %s650_s24  ;;  %v307_v20 = vld.sshfl [vmem:[#allocation1 + $0x8] sm:$0xff pattern:$0x73625140]  ;;  %v309_v21 = vld.sshfl [vmem:[#allocation1 + $0x10] sm:$0xff pattern:$0x73625140] }
  0x44   : > { %317 = vrot.lane.b32.xlu2 %v309_v21, %s651_s25  ;;  %v311_v22 = vld.sshfl [vmem:[#allocation1 + $0x18] sm:$0xff pattern:$0x73625140]  ;;  %v305_v23 = vld.sshfl [vmem:[#allocation1] sm:$0xff pattern:$0x73625140] }
  0x45   : > { %326 = vst [vmem:[#allocation1 + $0x2] ss:$4 sm:$0xff] %v696_v0 }
  0x4b   : > { %313 = vrot.lane.b32.xlu1 %v305_v23, %s651_s25 }
  0x4c   : > { %319 = vrot.lane.b32.xlu2 %v311_v22, %s651_s25  ;;  %v331_v24 = vld.sshfl [vmem:[#allocation1 + $0x10] sm:$0xff pattern:$0x73625140]  ;;  %v333_v25 = vld.sshfl [vmem:[#allocation1 + $0x18] sm:$0xff pattern:$0x73625140] }
  0x4d   : > { %339 = vrot.lane.b32.xlu0 %v331_v24, %s652_s26  ;;  %v329_v26 = vld.sshfl [vmem:[#allocation1 + $0x8] sm:$0xff pattern:$0x73625140]  ;;  %v327_v27 = vld.sshfl [vmem:[#allocation1] sm:$0xff pattern:$0x73625140] }
  0x4e   : > { %348 = vst [vmem:[#allocation1 + $0x3] ss:$4 sm:$0xff] %v696_v0 }
  0x53   : > { %341 = vrot.lane.b32.xlu1 %v333_v25, %s652_s26 }
  0x54   : > { %315 = vrot.lane.b32.xlu2 %v307_v20, %s651_s25 }
  0x55   : > { %337 = vrot.lane.b32.xlu0 %v329_v26, %s652_s26  ;;  %v355_v28 = vld.sshfl [vmem:[#allocation1 + $0x18] sm:$0xff pattern:$0x73625140]  ;;  %v351_v29 = vld.sshfl [vmem:[#allocation1 + $0x8] sm:$0xff pattern:$0x73625140] }
  0x56   : > { %v353_v30 = vld.sshfl [vmem:[#allocation1 + $0x10] sm:$0xff pattern:$0x73625140]  ;;  %v349_v31 = vld.sshfl [vmem:[#allocation1] sm:$0xff pattern:$0x73625140] }
  0x57   : > { %369 = vst [vmem:[#allocation1] ss:$4 sm:$0xff] %v696_v0 }
  0x5b   : > { %359 = vrot.lane.b32.xlu1 %v351_v29, %s653_s27 }
  0x5c   : > { %335 = vrot.lane.b32.xlu2 %v327_v27, %s652_s26 }
  0x5d   : > { %363 = vrot.lane.b32.xlu0 %v355_v28, %s653_s27 }
  0x5e   : > { %v370_v32 = vld.sshfl [vmem:[#allocation1] sm:$0xff pattern:$0x73625140]  ;;  %v372_v33 = vld.sshfl [vmem:[#allocation1 + $0x8] sm:$0xff pattern:$0x73625140] }
  0x5f   : > { %v374_v34 = vld.sshfl [vmem:[#allocation1 + $0x10] sm:$0xff pattern:$0x73625140]  ;;  %v376_v35 = vld.sshfl [vmem:[#allocation1 + $0x18] sm:$0xff pattern:$0x73625140] }
  0x63   : > { %248 = vrot.lane.b32.xlu1 %v240_v8, %s648_s22 }
  0x64   : > { %361 = vrot.lane.b32.xlu2 %v353_v30, %s653_s27 }
  0x65   : > { %357 = vrot.lane.b32.xlu0 %v349_v31, %s653_s27 }
  0x6b   : > { %378 = vrot.lane.b32.xlu1 %v370_v32, %s654_s28 }
  0x6c   : > { %380 = vrot.lane.b32.xlu2 %v372_v33, %s654_s28 }
  0x6d   : > { %382 = vrot.lane.b32.xlu0 %v374_v34, %s654_s28 }
  0x73   : > { %272 = vrot.lane.b32.xlu1 %v264_v14, %s649_s23 }
  0x74   : > { %250 = vrot.lane.b32.xlu2 %v712_v9, %s648_s22 }
  0x75   : > { %384 = vrot.lane.b32.xlu0 %v376_v35, %s654_s28 }
  0x7a   : > { %v731_v36 = vpop.permute.xlu2 %226 }
  0x7d   : > { %228 = vrot.lane.b32.xlu0 %v707_v6, %s647_s21 }
  0x85   : > { %270 = vrot.lane.b32.xlu0 %v262_v13, %s649_s23 }
  0x8c   : > { %v277_v39 = vpop.permute.xlu2 %276 }
  0x92   : > { %v233_v37 = vpop.permute.xlu1 %232 }
  0x93   : > { %v733_v38 = vpop.permute.xlu0 %230 }
  0x94   : > { %v237_v40 = vsel %vm234_vm0, %v733_v38, %v233_v37 }
  0x95   : > { %v396_v41 = vsel %vm390_vm1, %v703_v3, %v237_v40  ;;  %v292_v46 = vpop.permute.xlu2 %291 }
  0x9c   : > { %v255_v42 = vpop.permute.xlu1 %254  ;;  %v739_v43 = vpop.permute.xlu0 %252 }
  0x9d   : > { %v259_v44 = vsel %vm256_vm2, %v739_v43, %v255_v42 }
  0x9e   : > { %v403_v45 = vsel %vm397_vm3, %v396_v41, %v259_v44  ;;  %v318_v50 = vpop.permute.xlu2 %317 }
  0xa5   : > { %v744_v47 = vpop.permute.xlu1 %274 }
  0xa6   : > { %v281_v48 = vsel %vm278_vm4, %v744_v47, %v277_v39  ;;  %v320_v52 = vpop.permute.xlu2 %319 }
  0xa7   : > { %v749_v49 = vsel %vm404_vm5, %v403_v45, %v281_v48  ;;  %v324_v26 = vsel %vm321_vm7, %v318_v50, %v320_v52 }
  0xad   : > { %v296_v51 = vpop.permute.xlu1 %295 }
  0xae   : > { %v294_v54 = vpop.permute.xlu0 %293  ;;  %v316_v56 = vpop.permute.xlu2 %315 }
  0xaf   : > { %v323_v8 = vsel %vm321_vm7, %v316_v56, %v318_v50  ;;  %v300_v12 = vsel %vm299_vm9, %v292_v46, %v294_v54  ;;  %v301_v13 = vsel %vm299_vm9, %v294_v54, %v296_v51 }
  0xb0   : > { %v419_v21 = vsel %vm390_vm1, %v301_v13, %v323_v8 }
  0xb5   : > { %v298_v53 = vpop.permute.xlu1 %297 }
  0xb6   : > { %v336_v60 = vpop.permute.xlu2 %335  ;;  %v302_v27 = vsel %vm299_vm9, %v296_v51, %v298_v53  ;;  %v495_v51 = vld [vmem:[%s817_s2] sm:$0x7] }
  0xb7   : > { %v422_v32 = vsel %vm390_vm1, %v302_v27, %v324_v26  ;;  %v498_v53 = vperm.slane %v495_v51, 1  ;;  %v499_v54 = vperm.slane %v495_v51, 2 }
  0xbd   : > { %v314_v55 = vpop.permute.xlu1 %313 }
  0xbe   : > { %v362_v63 = vpop.permute.xlu2 %361  ;;  %v322_v6 = vsel %vm321_vm7, %v314_v55, %v316_v56 }
  0xbf   : > { %v340_v57 = vpop.permute.xlu0 %339  ;;  %v416_v16 = vsel %vm390_vm1, %v300_v12, %v322_v6 }
  0xc5   : > { %v342_v58 = vpop.permute.xlu1 %341 }
  0xc6   : > { %v381_v4 = vpop.permute.xlu2 %380  ;;  %v346_v29 = vsel %vm343_vm8, %v340_v57, %v342_v58 }
  0xc7   : > { %v338_v59 = vpop.permute.xlu0 %337  ;;  %v428_v33 = vsel %vm397_vm3, %v422_v32, %v346_v29 }
  0xc8   : > { %v344_v9 = vsel %vm343_vm8, %v336_v60, %v338_v59  ;;  %v345_v17 = vsel %vm343_vm8, %v338_v59, %v340_v57 }
  0xc9   : > { %v424_v20 = vsel %vm397_vm3, %v416_v16, %v344_v9  ;;  %v426_v23 = vsel %vm397_vm3, %v419_v21, %v345_v17 }
  0xcd   : > { %v360_v61 = vpop.permute.xlu1 %359 }
  0xce   : > { %v367_v19 = vsel %vm365_vm10, %v360_v61, %v362_v63  ;;  %v251_v35 = vpop.permute.xlu2 %250 }
  0xcf   : > { %v364_v62 = vpop.permute.xlu0 %363  ;;  %v433_v24 = vsel %vm404_vm5, %v426_v23, %v367_v19  ;;  %v258_v41 = vsel %vm256_vm2, %v251_v35, %v739_v43 }
  0xd0   : > { %v368_v31 = vsel %vm365_vm10, %v362_v63, %v364_v62 }
  0xd1   : > { %v436_v34 = vsel %vm404_vm5, %v428_v33, %v368_v31 }
  0xd5   : > { %v249_v0 = vpop.permute.xlu1 %248 }
  0xd7   : > { %v358_v3 = vpop.permute.xlu0 %357 }
  0xd8   : > { %v366_v14 = vsel %vm365_vm10, %v358_v3, %v360_v61 }
  0xd9   : > { %v430_v22 = vsel %vm404_vm5, %v424_v20, %v366_v14 }
  0xdd   : > { %v379_v5 = vpop.permute.xlu1 %378 }
  0xde   : > { %v387_v7 = vsel %vm386_vm6, %v379_v5, %v381_v4 }
  0xdf   : > { %v383_v10 = vpop.permute.xlu0 %382  ;;  %v444_v11 = vsel %vm390_vm1, %v387_v7, 0 }
  0xe0   : > { %457 = vmatpush.bf16.msra.mxu0 %v444_v11  ;;  %v388_v15 = vsel %vm386_vm6, %v381_v4, %v383_v10 }
  0xe1   : > { %v447_v18 = vsel %vm390_vm1, %v388_v15, 0 }
  0xe2   : > { %470 = vmatpush.bf16.msra.mxu1 %v447_v18 }
  0xe4   : > { %458 = vmatpush.bf16.msra.mxu0 %v430_v22 }
  0xe5   : > { %v273_v37 = vpop.permute.xlu1 %272 }
  0xe6   : > { %471 = vmatpush.bf16.msra.mxu1 %v433_v24  ;;  %v280_v44 = vsel %vm278_vm4, %v273_v37, %v744_v47  ;;  %v257_v47 = vsel %vm256_vm2, %v249_v0, %v251_v35 }
  0xe7   : > { %v385_v25 = vpop.permute.xlu0 %384 }
  0xe8   : > { %v389_v28 = vsel %vm386_vm6, %v383_v10, %v385_v25 }
  0xe9   : > { %v450_v30 = vsel %vm390_vm1, %v389_v28, 0 }
  0xea   : > { %483 = vmatpush.bf16.msra.mxu2 %v450_v30 }
  0xee   : > { %484 = vmatpush.bf16.msra.mxu2 %v436_v34 }
  0xef   : > { %v229_v39 = vpop.permute.xlu0 %228 }
  0xf0   : > { %v236_v40 = vsel %vm234_vm0, %v229_v39, %v733_v38  ;;  %v235_v45 = vsel %vm234_vm0, %v731_v36, %v229_v39  ;;  %v438_v38 = vld [vmem:[%s816_s1] sm:$0xf] }
  0xf1   : > { %v394_v42 = vsel %vm390_vm1, %v701_v2, %v236_v40  ;;  %v392_v2 = vsel %vm390_vm1, %v699_v1, %v235_v45  ;;  %v497_v1 = vperm.slane %v495_v51, 0 }
  0xf2   : > { %485 = vmatpush.bf16.msra.mxu2 %v749_v49  ;;  %v401_v46 = vsel %vm397_vm3, %v394_v42, %v258_v41  ;;  %v399_v49 = vsel %vm397_vm3, %v392_v2, %v257_v47 }
  0xf3   : > { %v409_v43 = vsel %vm404_vm5, %v401_v46, %v280_v44 }
  0xf4   : > { %472 = vmatpush.bf16.msra.mxu1 %v409_v43 }
  0xf5   : > { %618 = vmatmul.msk.bf16.vlgmr.msra.gmra.mxu2 %vm439_vm11, %v438_v38 }
  0xf7   : > { %v271_v36 = vpop.permute.xlu0 %270  ;;  %617 = vmatmul.msk.bf16.vlgmr.msra.gmra.mxu1 %vm439_vm11, %v438_v38 }
  0xf8   : > { %v279_v48 = vsel %vm278_vm4, %v271_v36, %v273_v37 }
  0xf9   : > { %v406_v50 = vsel %vm404_vm5, %v399_v49, %v279_v48 }
  0xfa   : > { %459 = vmatpush.bf16.msra.mxu0 %v406_v50 }
  0xfd   : > { %616 = vmatmul.msk.bf16.vlgmr.msra.gmra.mxu0 %vm439_vm11, %v438_v38 }
 0x174   : > { %v474_v52 = vpop.f32.mrf.mxu1 }
 0x175   : > { %v504_v56 = vmul.f32 %v498_v53, %v474_v52 }
 0x177   : > { %v511_v63 = vmul.f32 %v504_v56, %v474_v52 }
 0x178   : > { %v487_v55 = vpop.f32.mrf.mxu2 }
 0x179   : > { %v492_v57 = vpack.c.bf16 %v487_v55, %v487_v55  ;;  %v505_v61 = vmul.f32 %v499_v54, %v487_v55 }
 0x17a   : > { %v461_v58 = vpop.f32.mrf.mxu0 }
 0x17b   : > { %494 = vst [vmem:[%s204_s10 + $0x8] sm:$0xf] %v492_v57  ;;  %v491_v59 = vpack.c.bf16 %v474_v52, %v461_v58  ;;  %v503_v60 = vmul.f32 %v497_v1, %v461_v58  ;;  %v512_v5 = vmul.f32 %v505_v61, %v487_v55 }
 0x17c   : > { %v476_v62 = vpop.f32.mrf.mxu1 }
 0x17d   : > { %493 = vst [vmem:[%s204_s10] sm:$0xff] %v491_v59  ;;  %v510_v0 = vmul.f32 %v503_v60, %v461_v58  ;;  %v506_v3 = vadd.f32 %v504_v56, %v503_v60 }
 0x17f   : > { %v507_v4 = vadd.f32 %v506_v3, %v505_v61  ;;  %v513_v6 = vadd.f32 %v511_v63, %v510_v0 }
 0x180   : > { %v489_v7 = vpop.f32.mrf.mxu2 }
 0x181   : > { %508 = vadd.xlane.f32.xlu2 %v507_v4  ;;  %v514_v8 = vadd.f32 %v513_v6, %v512_v5 }
 0x182   : > { %v463_v9 = vpop.f32.mrf.mxu0 }
 0x183   : > { %515 = vadd.xlane.f32.xlu0 %v514_v8 }
 0x1f4   : > { %v509_v10 = vpop.xlane.xlu2 %508 }
 0x1f6   : > { %v516_v11 = vpop.xlane.xlu0 %515 }
 0x1f7   : > { %v518_v12 = vsel %vm517_vm12, %v509_v10, %v516_v11 }
 0x1f8   : > { %520 = vst.msk [vmem:[%s208_s13] sm:$0xff] %vm519_vm13, %v518_v12 }
 0x1f9 PF: > { %s15_s15 = sadd.s32 1, %s645_s15  }
 0x1fa   : > { %p12_p4 = scmp.ge.s32.totalorder %s15_s15, 4  }
 0x1fc   :  { %14 = sbr.rel (!%p12_p4) target bundleno = 1 (0x1), region = 80 }

</bundles_post_ra>
